<compile_context>
chip_gen: v5e
topology: v5e:2x2
jax: 0.10.0
libtpu: 0.0.40
codegen_flags: <defaults>
</compile_context>

<pallas_src>
import functools

import numpy as np
import jax
import jax.numpy as jnp
from jax import lax
from jax.experimental import pallas as pl
from jax.experimental.pallas import tpu as pltpu  # not needed for this no-grid kernel

_NEW_AXIS = "new"  # token for the size-1 axis created by unsqueeze


# ----------------------------------------------------------------------------
# Parameter generators (faithful shape-based ports of the PyTorch helpers;
# np.random consumption order matches the torch reference exactly).
# ----------------------------------------------------------------------------
def get_permute_parameter(shape):
    dim_vec = np.arange(len(shape))
    np.random.shuffle(dim_vec)
    return [int(d) for d in dim_vec]


def get_select_parameter(shape):
    tensor_size = list(shape)
    dim_value = 1
    flag = 0
    if len(tensor_size) == 0:
        return (0, 0)
    dim = int(np.random.randint(0, len(tensor_size)))
    while dim_value <= 1 and flag < len(tensor_size):
        dim = 0 if dim == len(tensor_size) - 1 else dim + 1
        dim_value = tensor_size[dim]
        flag += 1
    if dim_value == 1:
        return (0, 0)
    index = int(np.random.randint(1, dim_value))
    return (dim, index)


def get_squeeze_or_unsqueeze_parameter(shape):
    """("squeeze", axis) or ("unsqueeze", axis).  The short-circuited `and`
    matches the torch helper: with no size-1 dim the coin flip is NOT drawn."""
    one_dim = [i for i, v in enumerate(shape) if v == 1]
    is_squeeze = len(one_dim) != 0 and int(np.random.randint(0, 2)) == 0
    if is_squeeze:
        dim_index = int(np.random.randint(0, len(one_dim)))
        return ("squeeze", one_dim[dim_index])
    dim_index = int(np.random.randint(0, len(shape)))
    return ("unsqueeze", dim_index)


def draw_view_chain_params(in_shape):
    """Consume np.random in exactly the order ViewChain8.forward does."""
    in_shape = tuple(in_shape)
    perm1 = get_permute_parameter(in_shape)
    s1 = tuple(in_shape[a] for a in perm1)
    sq_op, sq_axis = get_squeeze_or_unsqueeze_parameter(s1)
    if sq_op == "squeeze":
        s2 = s1[:sq_axis] + s1[sq_axis + 1:]
    else:
        s2 = s1[:sq_axis] + (1,) + s1[sq_axis:]
    perm2 = get_permute_parameter(s2)
    s3 = tuple(s2[a] for a in perm2)
    sel_dim, sel_index = get_select_parameter(s3)
    return dict(in_shape=in_shape, perm1=perm1, sq_op=sq_op, sq_axis=sq_axis,
                perm2=perm2, sel_dim=sel_dim, sel_index=sel_index)


def compose_view_chain(params):
    """Collapse permute/(un)squeeze/permute/select into:
       (final_axes, selected_original_axis_or_None, select_index)."""
    axes = list(params["perm1"])                 # tokens = original axis ids
    if params["sq_op"] == "squeeze":
        axes.pop(params["sq_axis"])
    else:
        axes.insert(params["sq_axis"], _NEW_AXIS)
    axes = [axes[a] for a in params["perm2"]]
    removed, sel_index = None, None
    if len(axes) != 0:                           # torch: select only if dim()!=0
        removed = axes.pop(params["sel_dim"])
        sel_index = params["sel_index"]
    if removed == _NEW_AXIS:                     # degenerate all-size-1 case:
        removed, sel_index = None, None          # selecting index 0 of the new
    return axes, removed, sel_index              # size-1 axis is a data no-op


# ----------------------------------------------------------------------------
# Pallas kernel: fused static select (keepdims) + elementwise +1.
# Whole 8 KiB input is a single VMEM-resident block (no grid).
# ----------------------------------------------------------------------------
def _select_add_one_kernel(x_ref, o_ref, *, sel_axis, sel_index):
    v = x_ref[...]
    if sel_axis is not None:
        if sel_axis < v.ndim - 2:
            # Leading (untiled) axis: plain static width-1 slice.
            v = lax.slice_in_dim(v, sel_index, sel_index + 1, axis=sel_axis)
        else:
            # Sublane/lane axis: one-hot mask + keepdims reduce — only
            # guaranteed-lowerable ops, no unaligned sub-tile slicing on the
            # (8,128)-tiled dims.
            idx = lax.broadcasted_iota(jnp.int32, v.shape, sel_axis)
            v = jnp.sum(jnp.where(idx == sel_index, v, 0),
                        axis=sel_axis, keepdims=True)
    o_ref[...] = v + 1        # weakly-typed literal: no dtype promotion


# ----------------------------------------------------------------------------
# ViewChain8 forward: one pallas_call + one tiny (<=4 KiB) layout fixup.
# ----------------------------------------------------------------------------
def view_chain8_forward(x, params):
    final_axes, sel_axis, sel_index = compose_view_chain(params)
    in_shape = x.shape
    out_shape = tuple(1 if a == sel_axis else d for a, d in enumerate(in_shape))

    kernel = functools.partial(_select_add_one_kernel,
                               sel_axis=sel_axis, sel_index=sel_index)
    # Single fused pallas_call: no grid, whole-array blocks (x is only 8 KiB).
    y = pl.pallas_call(
        kernel,
        out_shape=jax.ShapeDtypeStruct(out_shape, x.dtype),
    )(x)

    # y holds the (+1)'d selected slice in ORIGINAL axis order with size-1
    # placeholders.  Rearrange the <=4 KiB result into the reference layout
    # (squeeze + transpose + expand_dims fuse into one tiny copy under jit).
    keep = [a for a in final_axes if a != _NEW_AXIS]      # surviving orig axes
    drop = tuple(a for a in range(len(in_shape)) if a not in keep)
    if drop:
        y = jnp.squeeze(y, axis=drop)
    pos = {a: i for i, a in enumerate(sorted(keep))}
    if keep:
        y = jnp.transpose(y, [pos[a] for a in keep])
    for i, tok in enumerate(final_axes):
        if tok == _NEW_AXIS:
            y = jnp.expand_dims(y, i)
    return y


# ----------------------------------------------------------------------------
# Pure-JAX reference: the exact op sequence of the PyTorch module.
# ----------------------------------------------------------------------------
def reference_forward(x, params):
    x = jnp.transpose(x, params["perm1"])
    if params["sq_op"] == "squeeze":
        x = jnp.squeeze(x, axis=params["sq_axis"])
    else:
        x = jnp.expand_dims(x, params["sq_axis"])
    x = jnp.transpose(x, params["perm2"])
    if x.ndim != 0:
        x = lax.index_in_dim(x, params["sel_index"], axis=params["sel_dim"],
                             keepdims=False)
    return x + 1.0


if __name__ == "__main__":
    key = jax.random.PRNGKey(0)
    x = jax.random.normal(key, (2, 4, 16, 16), dtype=jnp.float32)

    # View-chain parameters drawn from the seeded np.random stream, consumed in
    # the same order as the PyTorch module's forward.
    np.random.seed(0)
    params = draw_view_chain_params(x.shape)

    fwd = jax.jit(lambda xx: view_chain8_forward(xx, params))
    out = jax.block_until_ready(fwd(x))

    ref = reference_forward(x, params)

    assert out.shape == ref.shape, (out.shape, ref.shape)
    assert np.allclose(np.asarray(out), np.asarray(ref), atol=1e-6, rtol=1e-6)
    print("KERNEL_OK")
</pallas_src>

<mosaic_0001>
module attributes {stable_mosaic.version = 11 : i64} {
  func.func @_select_add_one_kernel(%arg0: memref<2x4x16x16xf32, #tpu.memory_space<vmem>>, %arg1: memref<1x4x16x16xf32, #tpu.memory_space<vmem>>) attributes {dimension_semantics = [], scalar_prefetch = 0 : i64, scratch_operands = 0 : i64, tpu.core_type = #tpu.core_type<tc>} {
    %c0 = arith.constant 0 : index
    %c0_0 = arith.constant 0 : index
    %c0_1 = arith.constant 0 : index
    %c0_2 = arith.constant 0 : index
    %0 = vector.load %arg0[%c0, %c0_0, %c0_1, %c0_2] : memref<2x4x16x16xf32, #tpu.memory_space<vmem>>, vector<2x4x16x16xf32>
    %1 = vector.extract_strided_slice %0 {offsets = [1, 0, 0, 0], sizes = [1, 4, 16, 16], strides = [1, 1, 1, 1]} : vector<2x4x16x16xf32> to vector<1x4x16x16xf32>
    %cst = arith.constant 1.000000e+00 : f32
    %2 = vector.broadcast %cst : f32 to vector<1x4x16x16xf32>
    %3 = arith.addf %1, %2 : vector<1x4x16x16xf32>
    %c0_3 = arith.constant 0 : index
    %c0_4 = arith.constant 0 : index
    %c0_5 = arith.constant 0 : index
    %c0_6 = arith.constant 0 : index
    %4 = vector.load %arg1[%c0_3, %c0_4, %c0_5, %c0_6] : memref<1x4x16x16xf32, #tpu.memory_space<vmem>>, vector<1x4x16x16xf32>
    tpu.vector_store %arg1[%c0_3, %c0_4, %c0_5, %c0_6], %3 {strides = array<i32>} : memref<1x4x16x16xf32, #tpu.memory_space<vmem>>, vector<1x4x16x16xf32>,
    return
  }
}

</mosaic_0001>

<bundles_post_ra>
// kernel: _lambda_.1
= control target key start
LH: loop header
LB: loop body
LE: loop exit
PB: predicated region body
PF: predicated region fallthrough
CT: control target
= control target key end

     0   :  { %6 = vsyncpa [#allocation3], 0  ;;  %s83_s9 = smov [#allocation2]   ;;  %s84_s11 = smov 128   ;;  %s131_s0 = inlined_call_operand.hbm [shape: f32[2,4,16,16], index: 0, kind: input, shape index: {}]   ;;  %s132_s1 = inlined_call_operand.vmem [shape: f32[1,4,16,16], index: 1, kind: output, shape index: {}]  }
   0x1   :  { %s11_s8 = sshll.u32 %s131_s0, 4  ;;  %s13_s10 = sshll.u32 %s83_s9, 4  ;;  %s12_s8 = int_to_ptr.hbm [resolvable:$true] %s11_s8  ;;  %s14_s10 = int_to_ptr.vmem [resolvable:$true] %s13_s10 }
   0x2   :  { %s85_s12 = smov 8  }
   0x3   :  { %19 = dma.hbm_to_vmem [thread:$0]  %s12_s8, 2048, %s14_s10, [#allocation3], %s84_s11, %s84_s11, %s85_s12  }
   0x4   :  { %81 = dma.done.wait [#allocation3], 2048  }
   0x5   :  { %82 = vsyncadd [#allocation3], 4294965248  ;;  %v24_v0 = vld [vmem:[#allocation2 + $0x40] sm:$0xff]  ;;  %vm40_vm0 = vcmask 130048   ;;  %v25_v1 = vld [vmem:[#allocation2 + $0x48] sm:$0xff] }
   0x6   :  { %v26_v2 = vld [vmem:[#allocation2 + $0x50] sm:$0xff]  ;;  %v32_v3 = vadd.f32 1.0, %v24_v0  ;;  %v33_v4 = vadd.f32 1.0, %v25_v1  ;;  %v27_v6 = vld [vmem:[#allocation2 + $0x58] sm:$0xff]  ;;  %v28_v7 = vld [vmem:[#allocation2 + $0x60] sm:$0xff] }
   0x7   :  { %v34_v5 = vadd.f32 1.0, %v26_v2  ;;  %v29_v8 = vld [vmem:[#allocation2 + $0x68] sm:$0xff]  ;;  %v35_v9 = vadd.f32 1.0, %v27_v6  ;;  %v30_v10 = vld [vmem:[#allocation2 + $0x70] sm:$0xff]  ;;  %v36_v11 = vadd.f32 1.0, %v28_v7  ;;  %v31_v12 = vld [vmem:[#allocation2 + $0x78] sm:$0xff] }
   0x8   :  { %41 = vst.msk [vmem:[%s132_s1] sm:$0xff] %vm40_vm0, %v32_v3  ;;  %v37_v13 = vadd.f32 1.0, %v29_v8  ;;  %v38_v14 = vadd.f32 1.0, %v30_v10  ;;  %v39_v15 = vadd.f32 1.0, %v31_v12 }
   0x9   :  { %42 = vst.msk [vmem:[%s132_s1 + $0x8] sm:$0xff] %vm40_vm0, %v33_v4 }
   0xa   :  { %43 = vst.msk [vmem:[%s132_s1 + $0x10] sm:$0xff] %vm40_vm0, %v34_v5 }
   0xb   :  { %44 = vst.msk [vmem:[%s132_s1 + $0x18] sm:$0xff] %vm40_vm0, %v35_v9 }
   0xc   :  { %45 = vst.msk [vmem:[%s132_s1 + $0x20] sm:$0xff] %vm40_vm0, %v36_v11 }
   0xd   :  { %46 = vst.msk [vmem:[%s132_s1 + $0x28] sm:$0xff] %vm40_vm0, %v37_v13 }
   0xe   :  { %47 = vst.msk [vmem:[%s132_s1 + $0x30] sm:$0xff] %vm40_vm0, %v38_v14 }
   0xf   :  { %48 = vst.msk [vmem:[%s132_s1 + $0x38] sm:$0xff] %vm40_vm0, %v39_v15 }
  0x10   :  { %53 = vsyncpa [#allocation3], 1 }

</bundles_post_ra>
